<compile_context>
chip_gen: v7x
topology: tpu7x:2x2x1
jax: 0.10.0
libtpu: 0.0.40
codegen_flags: <defaults>
</compile_context>

<pallas_src>
import jax
import jax.numpy as jnp
from jax.experimental import pallas as pl
from jax.experimental.pallas import tpu as pltpu

HIDDEN = 512
LANE = 128


def _round_up(x, m):
    return (x + m - 1) // m * m


def classifier_kernel(x_ref, w1_ref, b1_ref, w2_ref, b2_ref, prob_ref, logit_ref):
    # fc1: bf16 MXU matmul, f32 accumulate; bias add + ReLU in f32 on the VPU.
    h = jnp.dot(x_ref[...], w1_ref[...], preferred_element_type=jnp.float32)
    h = jnp.maximum(h + b1_ref[...], 0.0)

    # fc2 -> logits over the lane-dense (padded to 128) class dim.
    # Padded bias entries are a huge negative constant, so exp() of padded
    # logits underflows to 0 and they contribute nothing to the softmax.
    logits = (
        jnp.dot(h.astype(w2_ref.dtype), w2_ref[...], preferred_element_type=jnp.float32)
        + b2_ref[...]
    )
    logit_ref[...] = logits.astype(logit_ref.dtype)

    # Max-stabilized softmax in f32; approx reciprocal runs in the (idle) EUP slot.
    m = jnp.max(logits, axis=-1, keepdims=True)
    e = jnp.exp(logits - m)
    denom = jnp.sum(e, axis=-1, keepdims=True)
    prob_ref[...] = (e * pl.reciprocal(denom, approx=True)).astype(prob_ref.dtype)


def classifier_forward(x, w1, b1, w2, b2, *, tb=512):
    """x: (B, z_dim) f32; w1: (z_dim, 512); b1: (1, 512) or (512,);
    w2: (512, y_dim); b2: (1, y_dim) or (y_dim,).
    Returns (prob_out, output) matching the PyTorch module (both (B, y_dim) f32)."""
    B, z_dim = x.shape
    hidden = w1.shape[1]
    y_dim = w2.shape[1]
    yp = _round_up(max(y_dim, LANE), LANE)  # lane-dense class dim

    # ---- operand prep: bf16 MXU inputs, f32 biases, padded class dim ----
    xb = x.astype(jnp.bfloat16)
    w1b = w1.astype(jnp.bfloat16)
    b1f = jnp.reshape(b1, (1, hidden)).astype(jnp.float32)
    w2p = (
        jnp.zeros((hidden, yp), dtype=jnp.bfloat16)
        .at[:, :y_dim]
        .set(w2.astype(jnp.bfloat16))
    )
    b2p = (
        jnp.full((1, yp), -1e30, dtype=jnp.float32)
        .at[:, :y_dim]
        .set(jnp.reshape(b2, (1, y_dim)).astype(jnp.float32))
    )

    # ---- batch tiling: tile only M; K=z_dim and the 512-wide hidden stay whole ----
    TB = min(tb, _round_up(B, 8))
    Bp = _round_up(B, TB)
    if Bp != B:
        xb = jnp.pad(xb, ((0, Bp - B), (0, 0)))
    grid = (Bp // TB,)

    out_shapes = (
        jax.ShapeDtypeStruct((Bp, yp), jnp.float32),  # prob (padded)
        jax.ShapeDtypeStruct((Bp, yp), jnp.float32),  # logits (padded)
    )

    flops = 2 * Bp * (z_dim * hidden + hidden * yp)
    bytes_accessed = (
        xb.size * 2 + w1b.size * 2 + w2p.size * 2
        + b1f.size * 4 + b2p.size * 4 + 2 * Bp * yp * 4
    )

    prob, logits = pl.pallas_call(
        classifier_kernel,
        out_shape=out_shapes,
        grid=grid,
        in_specs=[
            pl.BlockSpec((TB, z_dim), lambda i: (i, 0)),      # x tile per grid step
            pl.BlockSpec((z_dim, hidden), lambda i: (0, 0)),  # w1 resident
            pl.BlockSpec((1, hidden), lambda i: (0, 0)),      # b1 resident
            pl.BlockSpec((hidden, yp), lambda i: (0, 0)),     # w2 resident
            pl.BlockSpec((1, yp), lambda i: (0, 0)),          # b2 resident
        ],
        out_specs=(
            pl.BlockSpec((TB, yp), lambda i: (i, 0)),
            pl.BlockSpec((TB, yp), lambda i: (i, 0)),
        ),
        compiler_params=pltpu.CompilerParams(
            dimension_semantics=("parallel",),          # megacore sharding on v7x
            vmem_limit_bytes=32 * 1024 * 1024,          # explicit; fits v7x's 64 MiB
        ),
        cost_estimate=pl.CostEstimate(
            flops=flops,
            transcendentals=Bp * yp,      # exp per (row, class)
            bytes_accessed=bytes_accessed,
        ),
    )(xb, w1b, b1f, w2p, b2p)

    # slice off batch padding and the lane padding of the class dim
    return prob[:B, :y_dim], logits[:B, :y_dim]


if __name__ == "__main__":
    # Small shapes consistent with the module: z_dim=32 latent, y_dim=10 classes,
    # hidden=512 fixed by the module.
    B, z_dim, hidden, y_dim = 8, 32, HIDDEN, 10

    key = jax.random.PRNGKey(0)
    k_x, k_w1, k_b1, k_w2, k_b2 = jax.random.split(key, 5)

    x = jax.random.normal(k_x, (B, z_dim), dtype=jnp.float32)
    w1 = jax.random.uniform(
        k_w1, (z_dim, hidden), dtype=jnp.float32, minval=-1.0, maxval=1.0
    ) / jnp.sqrt(z_dim)
    b1 = jax.random.uniform(
        k_b1, (1, hidden), dtype=jnp.float32, minval=-1.0, maxval=1.0
    ) / jnp.sqrt(z_dim)
    w2 = jax.random.uniform(
        k_w2, (hidden, y_dim), dtype=jnp.float32, minval=-1.0, maxval=1.0
    ) / jnp.sqrt(hidden)
    b2 = jax.random.uniform(
        k_b2, (1, y_dim), dtype=jnp.float32, minval=-1.0, maxval=1.0
    ) / jnp.sqrt(hidden)

    prob_out, output = jax.jit(classifier_forward)(x, w1, b1, w2, b2)
    jax.block_until_ready((prob_out, output))

    # Reference in plain JAX, with matching bf16 operand quantization.
    xq = x.astype(jnp.bfloat16).astype(jnp.float32)
    w1q = w1.astype(jnp.bfloat16).astype(jnp.float32)
    w2q = w2.astype(jnp.bfloat16).astype(jnp.float32)
    h_ref = jnp.maximum(xq @ w1q + b1, 0.0)
    logits_ref = h_ref.astype(jnp.bfloat16).astype(jnp.float32) @ w2q + b2
    prob_ref = jax.nn.softmax(logits_ref, axis=1)

    assert output.shape == (B, y_dim) and prob_out.shape == (B, y_dim)
    assert jnp.allclose(output, logits_ref, atol=2e-2, rtol=2e-2)
    assert jnp.allclose(prob_out, prob_ref, atol=1e-2, rtol=2e-2)
    assert jnp.allclose(jnp.sum(prob_out, axis=1), 1.0, atol=5e-3)
    assert bool(jnp.all(prob_out >= 0.0))

    print("KERNEL_OK")
</pallas_src>

<mosaic_0001>
module attributes {stable_mosaic.version = 11 : i64} {
  func.func @classifier_kernel(%arg0: i32, %arg1: memref<8x32xbf16, #tpu.memory_space<vmem>>, %arg2: memref<32x512xbf16, #tpu.memory_space<vmem>>, %arg3: memref<1x512xf32, #tpu.memory_space<vmem>>, %arg4: memref<512x128xbf16, #tpu.memory_space<vmem>>, %arg5: memref<1x128xf32, #tpu.memory_space<vmem>>, %arg6: memref<8x128xf32, #tpu.memory_space<vmem>>, %arg7: memref<8x128xf32, #tpu.memory_space<vmem>>) attributes {dimension_semantics = [#tpu.dimension_semantics<parallel>], iteration_bounds = array<i64: 1>, scalar_prefetch = 0 : i64, scratch_operands = 0 : i64, tpu.core_type = #tpu.core_type<tc>, window_params = [{transform_indices = @transform_0, window_bounds = array<i64: 8, 32>}, {pipeline_mode = #tpu.pipeline_mode<synchronous>, transform_indices = @transform_1, window_bounds = array<i64: 32, 512>}, {pipeline_mode = #tpu.pipeline_mode<synchronous>, transform_indices = @transform_2, window_bounds = array<i64: 1, 512>}, {pipeline_mode = #tpu.pipeline_mode<synchronous>, transform_indices = @transform_3, window_bounds = array<i64: 512, 128>}, {pipeline_mode = #tpu.pipeline_mode<synchronous>, transform_indices = @transform_4, window_bounds = array<i64: 1, 128>}, {transform_indices = @transform_5, window_bounds = array<i64: 8, 128>}, {transform_indices = @transform_6, window_bounds = array<i64: 8, 128>}]} {
    %c0 = arith.constant 0 : index
    %c0_0 = arith.constant 0 : index
    %0 = vector.load %arg1[%c0, %c0_0] : memref<8x32xbf16, #tpu.memory_space<vmem>>, vector<8x32xbf16>
    %c0_1 = arith.constant 0 : index
    %c0_2 = arith.constant 0 : index
    %1 = vector.load %arg2[%c0_1, %c0_2] : memref<32x512xbf16, #tpu.memory_space<vmem>>, vector<32x512xbf16>
    %cst = arith.constant dense<0.000000e+00> : vector<8x512xf32>
    %2 = tpu.matmul %0, %1, %cst {dimension_numbers = #tpu.dot_dimension_numbers<[1], [0], [0], [1], [0, 0, 1, 1], [], []>} : vector<8x32xbf16>, vector<32x512xbf16>, vector<8x512xf32> -> vector<8x512xf32>
    %c0_3 = arith.constant 0 : index
    %c0_4 = arith.constant 0 : index
    %3 = vector.load %arg3[%c0_3, %c0_4] : memref<1x512xf32, #tpu.memory_space<vmem>>, vector<1x512xf32>
    %4 = vector.broadcast %3 : vector<1x512xf32> to vector<8x512xf32>
    %5 = arith.addf %2, %4 : vector<8x512xf32>
    %cst_5 = arith.constant 0.000000e+00 : f32
    %6 = vector.broadcast %cst_5 : f32 to vector<8x512xf32>
    %7 = arith.maximumf %5, %6 : vector<8x512xf32>
    %8 = arith.truncf %7 : vector<8x512xf32> to vector<8x512xbf16>
    %c0_6 = arith.constant 0 : index
    %c0_7 = arith.constant 0 : index
    %9 = vector.load %arg4[%c0_6, %c0_7] : memref<512x128xbf16, #tpu.memory_space<vmem>>, vector<512x128xbf16>
    %cst_8 = arith.constant dense<0.000000e+00> : vector<8x128xf32>
    %10 = tpu.matmul %8, %9, %cst_8 {dimension_numbers = #tpu.dot_dimension_numbers<[1], [0], [0], [1], [0, 0, 1, 1], [], []>} : vector<8x512xbf16>, vector<512x128xbf16>, vector<8x128xf32> -> vector<8x128xf32>
    %c0_9 = arith.constant 0 : index
    %c0_10 = arith.constant 0 : index
    %11 = vector.load %arg5[%c0_9, %c0_10] : memref<1x128xf32, #tpu.memory_space<vmem>>, vector<1x128xf32>
    %12 = vector.broadcast %11 : vector<1x128xf32> to vector<8x128xf32>
    %13 = arith.addf %10, %12 : vector<8x128xf32>
    %c0_11 = arith.constant 0 : index
    %c0_12 = arith.constant 0 : index
    %14 = vector.load %arg7[%c0_11, %c0_12] : memref<8x128xf32, #tpu.memory_space<vmem>>, vector<8x128xf32>
    tpu.vector_store %arg7[%c0_11, %c0_12], %13 {strides = array<i32>} : memref<8x128xf32, #tpu.memory_space<vmem>>, vector<8x128xf32>,
    %cst_13 = arith.constant dense<0xFF800000> : vector<8xf32>
    %15 = vector.multi_reduction <maximumf>, %13, %cst_13 [1] : vector<8x128xf32> to vector<8xf32>
    %16 = vector.shape_cast %15 : vector<8xf32> to vector<8x1xf32>
    %17 = vector.broadcast %16 : vector<8x1xf32> to vector<8x128xf32>
    %18 = arith.subf %13, %17 : vector<8x128xf32>
    %19 = math.exp %18 : vector<8x128xf32>
    %cst_14 = arith.constant dense<0.000000e+00> : vector<8xf32>
    %20 = vector.multi_reduction <add>, %19, %cst_14 [1] : vector<8x128xf32> to vector<8xf32>
    %21 = vector.shape_cast %20 : vector<8xf32> to vector<8x1xf32>
    %22 = tpu.reciprocal %21 {approx = true} : vector<8x1xf32> -> vector<8x1xf32>
    %23 = vector.broadcast %22 : vector<8x1xf32> to vector<8x128xf32>
    %24 = arith.mulf %19, %23 : vector<8x128xf32>
    %c0_15 = arith.constant 0 : index
    %c0_16 = arith.constant 0 : index
    %25 = vector.load %arg6[%c0_15, %c0_16] : memref<8x128xf32, #tpu.memory_space<vmem>>, vector<8x128xf32>
    tpu.vector_store %arg6[%c0_15, %c0_16], %24 {strides = array<i32>} : memref<8x128xf32, #tpu.memory_space<vmem>>, vector<8x128xf32>,
    return
  }
  func.func @transform_0(%arg0: i32) -> (i32, i32) {
    %c0_i32 = arith.constant 0 : i32
    %c0_i32_0 = arith.constant 0 : i32
    return %arg0, %c0_i32 : i32, i32
  }
  func.func @transform_1(%arg0: i32) -> (i32, i32) {
    %c0_i32 = arith.constant 0 : i32
    %c0_i32_0 = arith.constant 0 : i32
    %c0_i32_1 = arith.constant 0 : i32
    return %c0_i32, %c0_i32_0 : i32, i32
  }
  func.func @transform_2(%arg0: i32) -> (i32, i32) {
    %c0_i32 = arith.constant 0 : i32
    %c0_i32_0 = arith.constant 0 : i32
    %c0_i32_1 = arith.constant 0 : i32
    return %c0_i32, %c0_i32_0 : i32, i32
  }
  func.func @transform_3(%arg0: i32) -> (i32, i32) {
    %c0_i32 = arith.constant 0 : i32
    %c0_i32_0 = arith.constant 0 : i32
    %c0_i32_1 = arith.constant 0 : i32
    return %c0_i32, %c0_i32_0 : i32, i32
  }
  func.func @transform_4(%arg0: i32) -> (i32, i32) {
    %c0_i32 = arith.constant 0 : i32
    %c0_i32_0 = arith.constant 0 : i32
    %c0_i32_1 = arith.constant 0 : i32
    return %c0_i32, %c0_i32_0 : i32, i32
  }
  func.func @transform_5(%arg0: i32) -> (i32, i32) {
    %c0_i32 = arith.constant 0 : i32
    %c0_i32_0 = arith.constant 0 : i32
    return %arg0, %c0_i32 : i32, i32
  }
  func.func @transform_6(%arg0: i32) -> (i32, i32) {
    %c0_i32 = arith.constant 0 : i32
    %c0_i32_0 = arith.constant 0 : i32
    return %arg0, %c0_i32 : i32, i32
  }
}

</mosaic_0001>

<bundles_post_ra>
// kernel: classifier_forward.1
= control target key start
LH: loop header
LB: loop body
LE: loop exit
PB: predicated region body
PF: predicated region fallthrough
CT: control target
= control target key end

     0   :  { %12 = vsyncpa [#allocation3], 0  ;;  %v758_v2 = vmov 0   ;;  %vm96_vm0 = vcmask 261120   ;;  %s949_s0 = inlined_call_operand.vmem [shape: bf16[8,32], index: 0, kind: input, shape index: {}]   ;;  %s950_s1 = inlined_call_operand.vmem [shape: bf16[32,512], index: 1, kind: input, shape index: {}]   ;;  %s951_s2 = inlined_call_operand.vmem [shape: f32[1,512], index: 2, kind: input, shape index: {}]   ;;  %s952_s3 = inlined_call_operand.vmem [shape: bf16[512,128], index: 3, kind: input, shape index: {}]   ;;  %s953_s4 = inlined_call_operand.vmem [shape: f32[1,128], index: 4, kind: input, shape index: {}]   ;;  %s954_s5 = inlined_call_operand.hbm [shape: f32[8,128], index: 5, kind: output, shape index: {0}]   ;;  %s955_s6 = inlined_call_operand.hbm [shape: f32[8,128], index: 6, kind: output, shape index: {1}]  }
   0x1   :  { %v662_v0 = vld [vmem:[%s950_s1 + $0x4] ss:$16 sps:$4 sm:$0xff]   ;;  %v664_v1 = vld [vmem:[%s950_s1 + $0xc] ss:$16 sps:$4 sm:$0xff]   ;;  %132 = vmatprep.mubr.bf16.mxu0 %v758_v2  ;;  %173 = vmatprep.mubr.bf16.mxu1 %v758_v2  ;;  %v666_v3 = vld [vmem:[%s950_s1] ss:$16 sps:$4 sm:$0xff]  }
   0x2   :  { %100 = vmatprep.subr.bf16.mxu0 %v662_v0  ;;  %v667_v4 = vld [vmem:[%s950_s1 + $0x8] ss:$16 sps:$4 sm:$0xff]   ;;  %141 = vmatprep.subr.bf16.mxu1 %v664_v1  ;;  %v668_v5 = vld [vmem:[%s950_s1 + $0x24] ss:$16 sps:$4 sm:$0xff]   ;;  %v670_v6 = vld [vmem:[%s950_s1 + $0x2c] ss:$16 sps:$4 sm:$0xff]  }
   0x3   :  { %101 = vmatpush1.bf16.msra.mxu0 %v666_v3  ;;  %142 = vmatpush1.bf16.msra.mxu1 %v667_v4  ;;  %v672_v7 = vld [vmem:[%s950_s1 + $0x20] ss:$16 sps:$4 sm:$0xff]   ;;  %v673_v8 = vld [vmem:[%s950_s1 + $0x28] ss:$16 sps:$4 sm:$0xff]  }
   0x4   :  { %102 = vmatprep.subr.bf16.mxu0 %v668_v5  ;;  %143 = vmatprep.subr.bf16.mxu1 %v670_v6  ;;  %v25_v9 = vld [vmem:[%s949_s0] sm:$0xf]  ;;  %v678_v14 = vld [vmem:[%s952_s3 + $0x48] sm:$0xff]   ;;  %v682_v18 = vld [vmem:[%s952_s3 + $0x50] sm:$0xff]  }
   0x5   :  { %v674_v10 = vld [vmem:[%s952_s3 + $0x40] sm:$0xff]   ;;  %v679_v15 = vld [vmem:[%s952_s3 + $0xc8] sm:$0xff]   ;;  %v683_v19 = vld [vmem:[%s952_s3 + $0xd0] sm:$0xff]  }
   0x6   :  { %v675_v11 = vld [vmem:[%s952_s3 + $0xc0] sm:$0xff]   ;;  %v680_v16 = vld [vmem:[%s952_s3 + $0x8] sm:$0xff]   ;;  %v684_v20 = vld [vmem:[%s952_s3 + $0x10] sm:$0xff]  }
   0x7   :  { %103 = vmatpush1.bf16.msra.mxu0 %v672_v7  ;;  %144 = vmatpush1.bf16.msra.mxu1 %v673_v8  ;;  %v676_v12 = vld [vmem:[%s952_s3] sm:$0xff]   ;;  %v681_v17 = vld [vmem:[%s952_s3 + $0x88] sm:$0xff]   ;;  %v685_v21 = vld [vmem:[%s952_s3 + $0x90] sm:$0xff]  }
   0x8   :  { %615 = vmatprep.subr.bf16.mxu0 %v674_v10  ;;  %637 = vmatprep.subr.bf16.mxu1 %v675_v11  ;;  %v677_v13 = vld [vmem:[%s952_s3 + $0x80] sm:$0xff]   ;;  %v686_v22 = vld [vmem:[%s952_s3 + $0x58] sm:$0xff]   ;;  %v694_v30 = vld [vmem:[%s952_s3 + $0x68] sm:$0xff]  }
   0x9   :  { %v687_v23 = vld [vmem:[%s952_s3 + $0xd8] sm:$0xff]   ;;  %v690_v26 = vld [vmem:[%s952_s3 + $0x60] sm:$0xff]   ;;  %v695_v31 = vld [vmem:[%s952_s3 + $0xe8] sm:$0xff]  }
   0xa   :  { %580 = vmatmul.mubr.msk.bf16.vlgmr.msra.gmra.mrb[0].mxu0 %vm96_vm0, %v25_v9  ;;  %581 = vmatmul.mubr.msk.bf16.vlgmr.msra.gmra.mrb[0].mxu1 %vm96_vm0, %v25_v9  ;;  %v688_v24 = vld [vmem:[%s952_s3 + $0x18] sm:$0xff]   ;;  %v691_v27 = vld [vmem:[%s952_s3 + $0xe0] sm:$0xff]   ;;  %v696_v32 = vld [vmem:[%s952_s3 + $0x28] sm:$0xff]  }
   0xb   :  { %616 = vmatpush3.bf16.msra.mxu0 %v676_v12  ;;  %638 = vmatpush3.bf16.msra.mxu1 %v677_v13  ;;  %v689_v25 = vld [vmem:[%s952_s3 + $0x98] sm:$0xff]   ;;  %v692_v28 = vld [vmem:[%s952_s3 + $0x20] sm:$0xff]   ;;  %v697_v33 = vld [vmem:[%s952_s3 + $0xa8] sm:$0xff]  }
   0xc   :  { %617 = vmatprep.subr.bf16.mxu0 %v678_v14  ;;  %639 = vmatprep.subr.bf16.mxu1 %v679_v15  ;;  %v693_v29 = vld [vmem:[%s952_s3 + $0xa0] sm:$0xff]  }
   0xf   :  { %618 = vmatpush3.bf16.msra.mxu0 %v680_v16  ;;  %640 = vmatpush3.bf16.msra.mxu1 %v681_v17 }
  0x10   :  { %619 = vmatprep.subr.bf16.mxu0 %v682_v18  ;;  %641 = vmatprep.subr.bf16.mxu1 %v683_v19 }
  0x13   :  { %620 = vmatpush3.bf16.msra.mxu0 %v684_v20  ;;  %642 = vmatpush3.bf16.msra.mxu1 %v685_v21 }
  0x14   :  { %621 = vmatprep.subr.bf16.mxu0 %v686_v22  ;;  %643 = vmatprep.subr.bf16.mxu1 %v687_v23 }
  0x17   :  { %622 = vmatpush3.bf16.msra.mxu0 %v688_v24  ;;  %644 = vmatpush3.bf16.msra.mxu1 %v689_v25 }
  0x18   :  { %623 = vmatprep.subr.bf16.mxu0 %v690_v26  ;;  %645 = vmatprep.subr.bf16.mxu1 %v691_v27 }
  0x1b   :  { %624 = vmatpush3.bf16.msra.mxu0 %v692_v28  ;;  %646 = vmatpush3.bf16.msra.mxu1 %v693_v29 }
  0x1c   :  { %625 = vmatprep.subr.bf16.mxu0 %v694_v30  ;;  %647 = vmatprep.subr.bf16.mxu1 %v695_v31 }
  0x1f   :  { %626 = vmatpush3.bf16.msra.mxu0 %v696_v32  ;;  %648 = vmatpush3.bf16.msra.mxu1 %v697_v33 }
  0x20   :  { %13 = vsyncpa [#allocation5], 0  ;;  %v698_v34 = vld [vmem:[%s952_s3 + $0x70] sm:$0xff]   ;;  %v702_v38 = vld [vmem:[%s952_s3 + $0x78] sm:$0xff]   ;;  %v36_v42 = vlaneseq  ;;  %s759_s27 = smov [#allocation4]  }
  0x21   :  { %v699_v35 = vld [vmem:[%s952_s3 + $0xf0] sm:$0xff]   ;;  %627 = vmatprep.subr.bf16.mxu0 %v698_v34  ;;  %v703_v39 = vld [vmem:[%s952_s3 + $0xf8] sm:$0xff]   ;;  %v34_v46 = vld [vmem:[%s951_s2] sm:$0xf] }
  0x22   :  { %v700_v36 = vld [vmem:[%s952_s3 + $0x30] sm:$0xff]   ;;  %649 = vmatprep.subr.bf16.mxu1 %v699_v35  ;;  %v704_v40 = vld [vmem:[%s952_s3 + $0x38] sm:$0xff]   ;;  %v37_v43 = vshrl.u32 %v36_v42, 7  ;;  %v582_v11 = vld [vmem:[%s953_s4] ss:$0 sm:$0xff]  ;;  %s560_s4 = sshll.u32 %s759_s27, 4  ;;  %s561_s4 = int_to_ptr.vmem [resolvable:$true] %s560_s4 }
  0x23   :  { %v701_v37 = vld [vmem:[%s952_s3 + $0xb0] sm:$0xff]   ;;  %628 = vmatpush3.bf16.msra.mxu0 %v700_v36  ;;  %v705_v41 = vld [vmem:[%s952_s3 + $0xb8] sm:$0xff]   ;;  %s710_s28 = scalar_lea.vmem %s561_s4, 128  ;;  %p715_p1 = scmp.lt.s32.totalorder %s561_s4, %s561_s4 }
  0x24   :  { %650 = vmatpush3.bf16.msra.mxu1 %v701_v37  ;;  %629 = vmatprep.subr.bf16.mxu0 %v702_v38  ;;  %v38_v44 = vsub.s32 0, %v37_v43  ;;  %v46_v45 = vsub.s32 2, %v37_v43  ;;  %v42_v47 = vsub.s32 1, %v37_v43  ;;  %v50_v48 = vsub.s32 3, %v37_v43  ;;  %p711_p0 = scmp.ne.s32.totalorder %s561_s4, %s710_s28  ;;  %p716_p2 = scmp.lt.s32.totalorder %s710_s28, %s710_s28 }
  0x25   :  { %651 = vmatprep.subr.bf16.mxu1 %v703_v39 }
  0x26   :  { %v39_v49 = vrot.slane %v34_v46, %v38_v44  ;;  %v47_v50 = vrot.slane %v34_v46, %v46_v45  ;;  %v43_v51 = vrot.slane %v34_v46, %v42_v47  ;;  %v51_v52 = vrot.slane %v34_v46, %v50_v48  ;;  %p717_p3 = por %p716_p2, %p715_p1 }
  0x27   :  { %630 = vmatpush3.bf16.msra.mxu0 %v704_v40 }
  0x28   :  { %652 = vmatpush3.bf16.msra.mxu1 %v705_v41  ;;  %p718_p4 = pnand %p717_p3, %p711_p0 }
  0xdd   :  { %v134_v53 = vpop.f32.mrb[0].mxu0  ;;  %v175_v54 = vpop.f32.mrb[0].mxu1 }
  0xde   :  { %v135_v55 = vadd.f32 %v134_v53, %v39_v49  ;;  %v176_v56 = vadd.f32 %v175_v54, %v47_v50  ;;  %v136_v57 = vpop.f32.mrb[1].mxu0  ;;  %v177_v58 = vpop.f32.mrb[1].mxu1 }
  0xdf   :  { %v137_v59 = vadd.f32 %v136_v57, %v43_v51  ;;  %v178_v60 = vadd.f32 %v177_v58, %v51_v52  ;;  %v138_v61 = vpop.f32.mrb[2].mxu0  ;;  %v179_v62 = vpop.f32.mrb[2].mxu1 }
  0xe0   :  { %v182_v63 = vmax.f32 %v135_v55, 0.0  ;;  %v184_v0 = vmax.f32 %v176_v56, 0.0  ;;  %v139_v1 = vpop.f32.mrb[3].mxu0  ;;  %v180_v2 = vpop.f32.mrb[3].mxu1 }
  0xe1   :  { %v183_v3 = vmax.f32 %v137_v59, 0.0  ;;  %v185_v4 = vmax.f32 %v178_v60, 0.0 }
  0xe2   :  { %v188_v5 = vpack.c.bf16 %v184_v0, %v184_v0  ;;  %v186_v8 = vpack.c.bf16 %v182_v63, %v182_v63 }
  0xe3   :  { %v187_v6 = vpack.c.bf16 %v183_v3, %v183_v3  ;;  %v189_v7 = vpack.c.bf16 %v185_v4, %v185_v4 }
  0xe5   :  { %485 = vmatprep.mubr.bf16.mxu0 %v187_v6  ;;  %525 = vmatprep.mubr.bf16.mxu1 %v189_v7 }
  0xe6   :  { %486 = vmatmul.mubr.bf16.vlgmr.msra.gmra.mrb[4].mxu0 %v186_v8  ;;  %526 = vmatmul.mubr.bf16.vlgmr.msra.gmra.mrb[4].mxu1 %v188_v5 }
 0x1b9   :  { %v631_v9 = vpop.f32.mrb[4].mxu0  ;;  %v653_v10 = vpop.f32.mrb[4].mxu1 }
 0x1ba   :  { %v632_v12 = vpop.f32.mrb[5].mxu0  ;;  %v654_v13 = vpop.f32.mrb[5].mxu1 }
 0x1bb   :  { %v633_v14 = vadd.f32 %v632_v12, %v631_v9  ;;  %v655_v15 = vadd.f32 %v654_v13, %v653_v10  ;;  %v634_v16 = vpop.f32.mrb[6].mxu0  ;;  %v656_v17 = vpop.f32.mrb[6].mxu1 }
 0x1bc   :  { %v635_v18 = vpop.f32.mrb[7].mxu0  ;;  %v657_v19 = vpop.f32.mrb[7].mxu1 }
 0x1bd   :  { %v488_v20 = vadd.f32 %v633_v14, %v582_v11 }
 0x1bf   :  { %v528_v21 = vadd.f32 %v655_v15, %v488_v20 }
 0x1c1   :  { %533 = vst [vmem:[#allocation4] sm:$0xff] %v528_v21  ;;  %534 = vmax.xlane.f32.xlu0 %v528_v21 }
 0x24e   :  { %v535_v22 = vpop.xlane.xlu0 %534 }
 0x24f   :  { %v536_v23 = vsub.f32 %v528_v21, %v535_v22 }
 0x251   :  { %v537_v24 = vmul.f32 1.442695, %v536_v23 }
 0x253   :  { %706 = vpow2.f32 %v537_v24 }
 0x25d   :  { %v707_v25 = vpop.eup %706 }
 0x25e   :  { %539 = vadd.xlane.f32.xlu0 %v707_v25 }
 0x25f   :  { %721 = shalt.err (!%p718_p4)
}
 0x260   :  { %s722_s7 = scalar_lea.hbm %s955_s6, 128 }
 0x261   :  { %p723_p5 = scmp.ne.s32.totalorder %s955_s6, %s722_s7  ;;  %p726_p6 = scmp.lt.u32.totalorder %s722_s7, %s955_s6 }
 0x263   :  { %p728_p7 = pnand %p726_p6, %p723_p5 }
 0x265   :  { %731 = shalt.err (!%p728_p7)
}
 0x266   :  { %563 = dma.vmem_to_hbm [thread:$0]  %s561_s4, 128, %s955_s6, [#allocation5]  }
 0x267   :  { %s760_s14 = smov [#allocation2]  }
 0x268   :  { %s550_s15 = sshll.u32 %s760_s14, 4  ;;  %s551_s15 = int_to_ptr.vmem [resolvable:$true] %s550_s15 }
 0x269   :  { %s732_s16 = scalar_lea.vmem %s551_s15, 128  ;;  %p737_p9 = scmp.lt.s32.totalorder %s551_s15, %s551_s15 }
 0x26a   :  { %p733_p8 = scmp.ne.s32.totalorder %s551_s15, %s732_s16  ;;  %p738_p10 = scmp.lt.s32.totalorder %s732_s16, %s732_s16 }
 0x26c   :  { %p739_p11 = por %p738_p10, %p737_p9 }
 0x26e   :  { %p740_p12 = pnand %p739_p11, %p733_p8 }
 0x2eb   :  { %v540_v26 = vpop.xlane.xlu0 %539 }
 0x2ec   :  { %708 = vrcp.f32 %v540_v26 }
 0x2f6   :  { %v709_v27 = vpop.eup %708 }
 0x2f7   :  { %v542_v28 = vmul.f32 %v709_v27, %v707_v25 }
 0x2f9   :  { %543 = vst [vmem:[#allocation2] sm:$0xff] %v542_v28 }
 0x2fa   :  { %743 = shalt.err (!%p740_p12)
}
 0x2fb   :  { %s744_s19 = scalar_lea.hbm %s954_s5, 128 }
 0x2fc   :  { %p745_p13 = scmp.ne.s32.totalorder %s954_s5, %s744_s19  ;;  %p748_p0 = scmp.lt.u32.totalorder %s744_s19, %s954_s5 }
 0x2fe   :  { %p750_p1 = pnand %p748_p0, %p745_p13 }
 0x300   :  { %753 = shalt.err (!%p750_p1)
}
 0x301   :  { %553 = dma.vmem_to_hbm [thread:$0]  %s551_s15, 128, %s954_s5, [#allocation3]  }
 0x302   :  { %754 = dma.done.wait [#allocation3], 128  }
 0x303   :  { %755 = vsyncadd [#allocation3], 4294967168 }
 0x304   :  { %756 = dma.done.wait [#allocation5], 128  }
 0x305   :  { %757 = vsyncadd [#allocation5], 4294967168 }
 0x306   :  { %570 = vsyncpa [#allocation3], 1 }
 0x307   :  { %571 = vsyncpa [#allocation5], 1 }

</bundles_post_ra>
